<compile_context>
chip_gen: v7x
topology: tpu7x:2x2x1
jax: 0.10.0
libtpu: 0.0.40
codegen_flags: <defaults>
</compile_context>

<pallas_src>
import functools

import jax
import jax.numpy as jnp
from jax import lax
from jax.experimental import pallas as pl
from jax.experimental.pallas import tpu as pltpu


# --------------------------------------------------------------------------- kernel

def attention_kernel(xk_ref, xq_ref, wt_ref, b_ref, o_ref, v_ref, *, compute_dtype):
    # xk_ref : (Bt, S,  D)  full-sequence block (keys + value-projection input)
    # xq_ref : (Bt, Tq, D)  query tile
    # wt_ref : (D, D)       weight, pre-transposed to (in_features, out_features)
    # b_ref  : (1, D)       bias
    # o_ref  : (Bt, Tq, D)  output tile
    # v_ref  : (Bt, S,  D)  VMEM scratch: value projection in compute dtype
    qi = pl.program_id(1)

    xk = xk_ref[...].astype(compute_dtype)

    # Value projection v = x @ W^T, computed once per batch tile (qi == 0) and reused
    # across all query tiles. The bias is folded onto the output instead (softmax rows
    # sum to one), so it is added to the small (Bt,Tq,D) tile, not the whole slab.
    @pl.when(qi == 0)
    def _():
        bt, s, d = xk.shape
        # S is a multiple of 8 (sublane) in practice -> this reshape is a pure relayout.
        v = lax.dot_general(
            xk.reshape(bt * s, d), wt_ref[...].astype(compute_dtype),
            dimension_numbers=(((1,), (0,)), ((), ())),
            preferred_element_type=jnp.float32)                    # (Bt*S, D) f32 acc
        v_ref[...] = v.reshape(bt, s, d).astype(v_ref.dtype)

    xq = xq_ref[...].astype(compute_dtype)

    # scores[b] = xq[b] @ xk[b]^T  -- contraction on the minor (feature) dim, batched;
    # no in-kernel transpose, bf16 operands, f32 accumulation.
    scores = lax.dot_general(
        xq, xk,
        dimension_numbers=(((2,), (2,)), ((0,), (0,))),
        preferred_element_type=jnp.float32)                        # (Bt, Tq, S) f32

    # Numerically stable row softmax statistics in f32.
    m = jnp.max(scores, axis=-1, keepdims=True)                    # (Bt, Tq, 1)
    # TODO(synk): on v6e/v7x the exp could run in bf16 (~2x EUP throughput); kept f32
    # here so the same kernel is exact-enough on v5e as well.
    e = jnp.exp(scores - m)                                        # (Bt, Tq, S) f32
    denom = jnp.sum(e, axis=-1, keepdims=True)                     # (Bt, Tq, 1)

    # P @ V with compute-dtype probabilities, f32 accumulation.
    ev = lax.dot_general(
        e.astype(compute_dtype), v_ref[...],
        dimension_numbers=(((2,), (1,)), ((0,), (0,))),
        preferred_element_type=jnp.float32)                        # (Bt, Tq, D) f32

    # Exact normalization (per review: approx reciprocal on a (Bt,Tq,1) tensor buys
    # nothing and costs accuracy) + bias folded onto the small output tile.
    out = ev / denom + b_ref[...].astype(jnp.float32)
    o_ref[...] = out.astype(o_ref.dtype)


# --------------------------------------------------------------------------- tiling

def _tpu_vmem_and_cores():
    """Best-effort chip introspection: (VMEM capacity in bytes, multi-TensorCore?)."""
    vmem_cap = 64 << 20          # conservative default = v7x (64 MiB per TC)
    multi_core = True            # conservative default = grid sharded over 2 TCs
    try:
        kind = jax.devices()[0].device_kind.lower()
    except Exception:
        kind = ""
    if any(t in kind for t in ("v4", "v5", "v6")):
        vmem_cap = 128 << 20
    if any(t in kind for t in ("v5 lite", "v5e", "v6")):
        multi_core = False       # v5e / v6e: single TensorCore per chip
    try:
        vmem_cap = int(pltpu.get_tpu_info().vmem_capacity_bytes)
    except Exception:
        pass
    return vmem_cap, multi_core


def _vmem_estimate(bt, tq, S, D, in_dsize, c_dsize):
    """Rough per-step live-VMEM bound (bytes) for a (bt, tq) tiling."""
    xk = 2 * bt * S * D * in_dsize          # double-buffered key/value input slab
    xq = 2 * bt * tq * D * in_dsize         # double-buffered query tile
    outb = 2 * bt * tq * D * in_dsize       # double-buffered output tile
    wt = D * D * in_dsize + D * in_dsize    # single-buffered invariant weight + bias
    scr = bt * S * D * c_dsize              # value-projection scratch
    sc = 2 * bt * tq * S * 4                # scores + exp (f32)
    sc += bt * tq * S * c_dsize             # exp cast to compute dtype for the MXU
    ev = bt * tq * D * 4                    # f32 P@V accumulator
    return xk + xq + outb + wt + scr + sc + ev


def _choose_tiles(B, S, D, in_dsize, c_dsize, vmem_budget, multi_core):
    """Pick (block_b, block_q). Largest tiles that fit the VMEM budget; on multi-TC
    chips keep the parallel batch-grid length even so both TensorCores get work.
    (For very large shapes prefer 256-multiples on v6e/v7x: the MXU is 256x256.)"""
    def divisors_desc(n):
        return [d for d in range(n, 0, -1) if n % d == 0]

    q_cands = [d for d in divisors_desc(S) if d == S or d % 8 == 0] or [S]

    for bt in divisors_desc(B):
        if multi_core and B % 2 == 0 and (B // bt) % 2 != 0:
            continue  # keep an even batch-grid on 2-TC chips when possible
        for tq in q_cands:
            if _vmem_estimate(bt, tq, S, D, in_dsize, c_dsize) <= vmem_budget:
                return bt, tq
    return 1, q_cands[-1]


# --------------------------------------------------------------------------- wrapper

def prepare_params(weight, bias):
    """One-time parameter preparation (hoisted out of the per-call path):
    nn.Linear stores W as (out, in); the kernel wants (in, out) so the projection
    contracts on the minor dim with no in-kernel transpose."""
    return weight.T, bias.reshape(1, -1)


def attention_layer(x, wt, bias2d, *, compute_dtype=jnp.bfloat16,
                    block_b=None, block_q=None):
    """x: (B, S, D); wt: (D, D) already in (in, out) layout; bias2d: (1, D)."""
    B, S, D = x.shape
    assert wt.shape == (D, D) and bias2d.shape == (1, D)

    in_dsize = jnp.dtype(x.dtype).itemsize
    c_dsize = jnp.dtype(compute_dtype).itemsize

    vmem_cap, multi_core = _tpu_vmem_and_cores()
    vmem_budget = min(int(0.75 * vmem_cap), vmem_cap - (16 << 20))
    vmem_limit = min(int(0.9 * vmem_cap), vmem_budget + (16 << 20))

    bt, tq = _choose_tiles(B, S, D, in_dsize, c_dsize, vmem_budget, multi_core)
    if block_b is not None:
        bt = block_b
    if block_q is not None:
        tq = block_q
    assert B % bt == 0 and S % tq == 0
    grid = (B // bt, S // tq)

    cost = pl.CostEstimate(
        flops=int(B * (4 * S * S * D + 2 * S * D * D)),
        transcendentals=int(B * S * S),
        bytes_accessed=int((3 * B * S * D + D * D + D) * in_dsize),
    )

    xk_spec = pl.BlockSpec((bt, S, D), lambda b, q: (b, 0, 0))   # full keys per batch tile
    xq_spec = pl.BlockSpec((bt, tq, D), lambda b, q: (b, q, 0))  # query tile
    out_spec = pl.BlockSpec((bt, tq, D), lambda b, q: (b, q, 0))

    def _call(single_buffer_invariants):
        # Grid-invariant operands: constant index_map (never re-DMA'd); request a
        # single VMEM buffer so the weight does not pay 2x VMEM for double-buffering.
        kwargs = dict(pipeline_mode=pl.Buffered(1)) if single_buffer_invariants else {}
        wt_spec = pl.BlockSpec((D, D), lambda b, q: (0, 0), **kwargs)
        b_spec = pl.BlockSpec((1, D), lambda b, q: (0, 0), **kwargs)
        return pl.pallas_call(
            functools.partial(attention_kernel, compute_dtype=compute_dtype),
            out_shape=jax.ShapeDtypeStruct((B, S, D), x.dtype),
            grid_spec=pltpu.PrefetchScalarGridSpec(
                num_scalar_prefetch=0,
                grid=grid,
                in_specs=[xk_spec, xq_spec, wt_spec, b_spec],
                out_specs=out_spec,
                scratch_shapes=[pltpu.VMEM((bt, S, D), compute_dtype)],
            ),
            compiler_params=pltpu.CompilerParams(
                # batch axis is independent (megacore-shardable); the query axis
                # carries the value-projection scratch -> arbitrary.
                dimension_semantics=("parallel", "arbitrary"),
                vmem_limit_bytes=int(vmem_limit),
            ),
            cost_estimate=cost,
        )(x, x, wt, bias2d)

    try:
        return _call(True)
    except Exception:
        # This JAX build rejected pipeline_mode=pl.Buffered(1); fall back to default
        # double-buffering for the (grid-invariant) weight / bias operands.
        return _call(False)


# --------------------------------------------------------------------------- test

def reference(x, weight, bias):
    hp = lax.Precision.HIGHEST
    scores = jnp.einsum("bsd,btd->bst", x, x, precision=hp)
    probs = jax.nn.softmax(scores, axis=-1)
    v = jnp.einsum("bsd,ed->bse", x, weight, precision=hp) + bias
    return jnp.einsum("bst,btd->bsd", probs, v, precision=hp)


if __name__ == "__main__":
    B, S, D = 2, 8, 32  # batch, seq, in_features

    key = jax.random.PRNGKey(0)
    kx, kw, kb = jax.random.split(key, 3)

    x = jax.random.normal(kx, (B, S, D), dtype=jnp.float32)
    # Deterministic init mimicking nn.Linear defaults (uniform in +-1/sqrt(in_features)).
    bound = 1.0 / jnp.sqrt(jnp.float32(D))
    weight = jax.random.uniform(kw, (D, D), minval=-bound, maxval=bound, dtype=jnp.float32)
    bias = jax.random.uniform(kb, (D,), minval=-bound, maxval=bound, dtype=jnp.float32)

    wt, b2 = prepare_params(weight, bias)   # hoisted one-time param prep
    ref = reference(x, weight, bias)

    # Default path: bf16 MXU operands, f32 accumulation / softmax stats.
    out = jax.block_until_ready(attention_layer(x, wt, b2))
    assert out.shape == (B, S, D)
    assert jnp.allclose(out, ref, atol=5e-2, rtol=5e-2), "bf16-compute mismatch vs reference"

    # f32 compute path (multi-pass MXU emulation) with the exact reciprocal restores
    # tight numerics per the review.
    out_f32 = jax.block_until_ready(attention_layer(x, wt, b2, compute_dtype=jnp.float32))
    assert jnp.allclose(out_f32, ref, atol=1e-3, rtol=1e-3), "f32-compute mismatch vs reference"

    print("KERNEL_OK")
</pallas_src>

<mosaic_0001>
module attributes {stable_mosaic.version = 11 : i64} {
  func.func @attention_kernel(%arg0: i32, %arg1: i32, %arg2: memref<1x8x32xf32, #tpu.memory_space<vmem>>, %arg3: memref<1x8x32xf32, #tpu.memory_space<vmem>>, %arg4: memref<32x32xf32, #tpu.memory_space<vmem>>, %arg5: memref<1x32xf32, #tpu.memory_space<vmem>>, %arg6: memref<1x8x32xf32, #tpu.memory_space<vmem>>, %arg7: memref<1x8x32xbf16, #tpu.memory_space<vmem>>) attributes {dimension_semantics = [#tpu.dimension_semantics<parallel>, #tpu.dimension_semantics<arbitrary>], iteration_bounds = array<i64: 2, 1>, scalar_prefetch = 0 : i64, scratch_operands = 1 : i64, tpu.core_type = #tpu.core_type<tc>, window_params = [{transform_indices = @transform_0, window_bounds = array<i64: 1, 8, 32>}, {transform_indices = @transform_1, window_bounds = array<i64: 1, 8, 32>}, {pipeline_mode = #tpu.pipeline_mode<synchronous>, transform_indices = @transform_2, window_bounds = array<i64: 32, 32>}, {pipeline_mode = #tpu.pipeline_mode<synchronous>, transform_indices = @transform_3, window_bounds = array<i64: 1, 32>}, {transform_indices = @transform_4, window_bounds = array<i64: 1, 8, 32>}]} {
    %c0 = arith.constant 0 : index
    %c0_0 = arith.constant 0 : index
    %c0_1 = arith.constant 0 : index
    %0 = vector.load %arg2[%c0, %c0_0, %c0_1] : memref<1x8x32xf32, #tpu.memory_space<vmem>>, vector<1x8x32xf32>
    %1 = arith.truncf %0 : vector<1x8x32xf32> to vector<1x8x32xbf16>
    %c0_i32 = arith.constant 0 : i32
    %2 = arith.cmpi eq, %arg1, %c0_i32 : i32
    %3 = arith.extui %2 : i1 to i32
    %c0_i32_2 = arith.constant 0 : i32
    %4 = arith.cmpi ne, %3, %c0_i32_2 : i32
    scf.if %4 {
      %25 = vector.shape_cast %1 : vector<1x8x32xbf16> to vector<8x32xbf16>
      %c0_17 = arith.constant 0 : index
      %c0_18 = arith.constant 0 : index
      %26 = vector.load %arg4[%c0_17, %c0_18] : memref<32x32xf32, #tpu.memory_space<vmem>>, vector<32x32xf32>
      %27 = arith.truncf %26 : vector<32x32xf32> to vector<32x32xbf16>
      %cst_19 = arith.constant dense<0.000000e+00> : vector<8x32xf32>
      %28 = tpu.matmul %25, %27, %cst_19 {dimension_numbers = #tpu.dot_dimension_numbers<[1], [0], [0], [1], [0, 0, 1, 1], [], []>} : vector<8x32xbf16>, vector<32x32xbf16>, vector<8x32xf32> -> vector<8x32xf32>
      %29 = vector.shape_cast %28 : vector<8x32xf32> to vector<1x8x32xf32>
      %30 = arith.truncf %29 : vector<1x8x32xf32> to vector<1x8x32xbf16>
      %c0_20 = arith.constant 0 : index
      %c0_21 = arith.constant 0 : index
      %c0_22 = arith.constant 0 : index
      %31 = vector.load %arg7[%c0_20, %c0_21, %c0_22] : memref<1x8x32xbf16, #tpu.memory_space<vmem>>, vector<1x8x32xbf16>
      tpu.vector_store %arg7[%c0_20, %c0_21, %c0_22], %30 {strides = array<i32>} : memref<1x8x32xbf16, #tpu.memory_space<vmem>>, vector<1x8x32xbf16>,
    } else {
    }
    %c0_3 = arith.constant 0 : index
    %c0_4 = arith.constant 0 : index
    %c0_5 = arith.constant 0 : index
    %5 = vector.load %arg3[%c0_3, %c0_4, %c0_5] : memref<1x8x32xf32, #tpu.memory_space<vmem>>, vector<1x8x32xf32>
    %6 = arith.truncf %5 : vector<1x8x32xf32> to vector<1x8x32xbf16>
    %cst = arith.constant dense<0.000000e+00> : vector<1x8x8xf32>
    %7 = tpu.matmul %6, %1, %cst {dimension_numbers = #tpu.dot_dimension_numbers<[2], [2], [1], [1], [0, 0, 0, 1, 1, 1], [0], [0]>} : vector<1x8x32xbf16>, vector<1x8x32xbf16>, vector<1x8x8xf32> -> vector<1x8x8xf32>
    %cst_6 = arith.constant dense<0xFF800000> : vector<1x8xf32>
    %8 = vector.multi_reduction <maximumf>, %7, %cst_6 [2] : vector<1x8x8xf32> to vector<1x8xf32>
    %9 = vector.shape_cast %8 : vector<1x8xf32> to vector<1x8x1xf32>
    %10 = vector.broadcast %9 : vector<1x8x1xf32> to vector<1x8x8xf32>
    %11 = arith.subf %7, %10 : vector<1x8x8xf32>
    %12 = math.exp %11 : vector<1x8x8xf32>
    %cst_7 = arith.constant dense<0.000000e+00> : vector<1x8xf32>
    %13 = vector.multi_reduction <add>, %12, %cst_7 [2] : vector<1x8x8xf32> to vector<1x8xf32>
    %14 = vector.shape_cast %13 : vector<1x8xf32> to vector<1x8x1xf32>
    %15 = arith.truncf %12 : vector<1x8x8xf32> to vector<1x8x8xbf16>
    %c0_8 = arith.constant 0 : index
    %c0_9 = arith.constant 0 : index
    %c0_10 = arith.constant 0 : index
    %16 = vector.load %arg7[%c0_8, %c0_9, %c0_10] : memref<1x8x32xbf16, #tpu.memory_space<vmem>>, vector<1x8x32xbf16>
    %cst_11 = arith.constant dense<0.000000e+00> : vector<1x8x32xf32>
    %17 = tpu.matmul %15, %16, %cst_11 {dimension_numbers = #tpu.dot_dimension_numbers<[2], [1], [1], [2], [0, 0, 0, 1, 1, 2], [0], [0]>} : vector<1x8x8xbf16>, vector<1x8x32xbf16>, vector<1x8x32xf32> -> vector<1x8x32xf32>
    %18 = vector.broadcast %14 : vector<1x8x1xf32> to vector<1x8x32xf32>
    %19 = arith.divf %17, %18 : vector<1x8x32xf32>
    %c0_12 = arith.constant 0 : index
    %c0_13 = arith.constant 0 : index
    %20 = vector.load %arg5[%c0_12, %c0_13] : memref<1x32xf32, #tpu.memory_space<vmem>>, vector<1x32xf32>
    %21 = vector.shape_cast %20 : vector<1x32xf32> to vector<1x1x32xf32>
    %22 = vector.broadcast %21 : vector<1x1x32xf32> to vector<1x8x32xf32>
    %23 = arith.addf %19, %22 : vector<1x8x32xf32>
    %c0_14 = arith.constant 0 : index
    %c0_15 = arith.constant 0 : index
    %c0_16 = arith.constant 0 : index
    %24 = vector.load %arg6[%c0_14, %c0_15, %c0_16] : memref<1x8x32xf32, #tpu.memory_space<vmem>>, vector<1x8x32xf32>
    tpu.vector_store %arg6[%c0_14, %c0_15, %c0_16], %23 {strides = array<i32>} : memref<1x8x32xf32, #tpu.memory_space<vmem>>, vector<1x8x32xf32>,
    return
  }
  func.func @transform_0(%arg0: i32, %arg1: i32) -> (i32, i32, i32) {
    %c0_i32 = arith.constant 0 : i32
    %c0_i32_0 = arith.constant 0 : i32
    %c0_i32_1 = arith.constant 0 : i32
    return %arg0, %c0_i32, %c0_i32_0 : i32, i32, i32
  }
  func.func @transform_1(%arg0: i32, %arg1: i32) -> (i32, i32, i32) {
    %c0_i32 = arith.constant 0 : i32
    %c0_i32_0 = arith.constant 0 : i32
    return %arg0, %arg1, %c0_i32 : i32, i32, i32
  }
  func.func @transform_2(%arg0: i32, %arg1: i32) -> (i32, i32) {
    %c0_i32 = arith.constant 0 : i32
    %c0_i32_0 = arith.constant 0 : i32
    %c0_i32_1 = arith.constant 0 : i32
    return %c0_i32, %c0_i32_0 : i32, i32
  }
  func.func @transform_3(%arg0: i32, %arg1: i32) -> (i32, i32) {
    %c0_i32 = arith.constant 0 : i32
    %c0_i32_0 = arith.constant 0 : i32
    %c0_i32_1 = arith.constant 0 : i32
    return %c0_i32, %c0_i32_0 : i32, i32
  }
  func.func @transform_4(%arg0: i32, %arg1: i32) -> (i32, i32, i32) {
    %c0_i32 = arith.constant 0 : i32
    %c0_i32_0 = arith.constant 0 : i32
    return %arg0, %arg1, %c0_i32 : i32, i32, i32
  }
}

module attributes {stable_mosaic.version = 11 : i64} {
  func.func @attention_kernel(%arg0: i32, %arg1: i32, %arg2: memref<1x8x32xf32, #tpu.memory_space<vmem>>, %arg3: memref<1x8x32xf32, #tpu.memory_space<vmem>>, %arg4: memref<32x32xf32, #tpu.memory_space<vmem>>, %arg5: memref<1x32xf32, #tpu.memory_space<vmem>>, %arg6: memref<1x8x32xf32, #tpu.memory_space<vmem>>, %arg7: memref<1x8x32xbf16, #tpu.memory_space<vmem>>) attributes {dimension_semantics = [#tpu.dimension_semantics<parallel>, #tpu.dimension_semantics<arbitrary>], iteration_bounds = array<i64: 2, 1>, scalar_prefetch = 0 : i64, scratch_operands = 1 : i64, tpu.core_type = #tpu.core_type<tc>, window_params = [{transform_indices = @transform_0, window_bounds = array<i64: 1, 8, 32>}, {transform_indices = @transform_1, window_bounds = array<i64: 1, 8, 32>}, {pipeline_mode = #tpu.pipeline_mode<synchronous>, transform_indices = @transform_2, window_bounds = array<i64: 32, 32>}, {pipeline_mode = #tpu.pipeline_mode<synchronous>, transform_indices = @transform_3, window_bounds = array<i64: 1, 32>}, {transform_indices = @transform_4, window_bounds = array<i64: 1, 8, 32>}]} {
    %c0 = arith.constant 0 : index
    %c0_0 = arith.constant 0 : index
    %c0_1 = arith.constant 0 : index
    %0 = vector.load %arg2[%c0, %c0_0, %c0_1] : memref<1x8x32xf32, #tpu.memory_space<vmem>>, vector<1x8x32xf32>
    %1 = arith.truncf %0 : vector<1x8x32xf32> to vector<1x8x32xbf16>
    %c0_i32 = arith.constant 0 : i32
    %2 = arith.cmpi eq, %arg1, %c0_i32 : i32
    %3 = arith.extui %2 : i1 to i32
    %c0_i32_2 = arith.constant 0 : i32
    %4 = arith.cmpi ne, %3, %c0_i32_2 : i32
    scf.if %4 {
      %25 = vector.shape_cast %1 : vector<1x8x32xbf16> to vector<8x32xbf16>
      %c0_17 = arith.constant 0 : index
      %c0_18 = arith.constant 0 : index
      %26 = vector.load %arg4[%c0_17, %c0_18] : memref<32x32xf32, #tpu.memory_space<vmem>>, vector<32x32xf32>
      %27 = arith.truncf %26 : vector<32x32xf32> to vector<32x32xbf16>
      %cst_19 = arith.constant dense<0.000000e+00> : vector<8x32xf32>
      %28 = tpu.matmul %25, %27, %cst_19 {dimension_numbers = #tpu.dot_dimension_numbers<[1], [0], [0], [1], [0, 0, 1, 1], [], []>} : vector<8x32xbf16>, vector<32x32xbf16>, vector<8x32xf32> -> vector<8x32xf32>
      %29 = vector.shape_cast %28 : vector<8x32xf32> to vector<1x8x32xf32>
      %30 = arith.truncf %29 : vector<1x8x32xf32> to vector<1x8x32xbf16>
      %c0_20 = arith.constant 0 : index
      %c0_21 = arith.constant 0 : index
      %c0_22 = arith.constant 0 : index
      %31 = vector.load %arg7[%c0_20, %c0_21, %c0_22] : memref<1x8x32xbf16, #tpu.memory_space<vmem>>, vector<1x8x32xbf16>
      tpu.vector_store %arg7[%c0_20, %c0_21, %c0_22], %30 {strides = array<i32>} : memref<1x8x32xbf16, #tpu.memory_space<vmem>>, vector<1x8x32xbf16>,
    } else {
    }
    %c0_3 = arith.constant 0 : index
    %c0_4 = arith.constant 0 : index
    %c0_5 = arith.constant 0 : index
    %5 = vector.load %arg3[%c0_3, %c0_4, %c0_5] : memref<1x8x32xf32, #tpu.memory_space<vmem>>, vector<1x8x32xf32>
    %6 = arith.truncf %5 : vector<1x8x32xf32> to vector<1x8x32xbf16>
    %cst = arith.constant dense<0.000000e+00> : vector<1x8x8xf32>
    %7 = tpu.matmul %6, %1, %cst {dimension_numbers = #tpu.dot_dimension_numbers<[2], [2], [1], [1], [0, 0, 0, 1, 1, 1], [0], [0]>} : vector<1x8x32xbf16>, vector<1x8x32xbf16>, vector<1x8x8xf32> -> vector<1x8x8xf32>
    %cst_6 = arith.constant dense<0xFF800000> : vector<1x8xf32>
    %8 = vector.multi_reduction <maximumf>, %7, %cst_6 [2] : vector<1x8x8xf32> to vector<1x8xf32>
    %9 = vector.shape_cast %8 : vector<1x8xf32> to vector<1x8x1xf32>
    %10 = vector.broadcast %9 : vector<1x8x1xf32> to vector<1x8x8xf32>
    %11 = arith.subf %7, %10 : vector<1x8x8xf32>
    %12 = math.exp %11 : vector<1x8x8xf32>
    %cst_7 = arith.constant dense<0.000000e+00> : vector<1x8xf32>
    %13 = vector.multi_reduction <add>, %12, %cst_7 [2] : vector<1x8x8xf32> to vector<1x8xf32>
    %14 = vector.shape_cast %13 : vector<1x8xf32> to vector<1x8x1xf32>
    %15 = arith.truncf %12 : vector<1x8x8xf32> to vector<1x8x8xbf16>
    %c0_8 = arith.constant 0 : index
    %c0_9 = arith.constant 0 : index
    %c0_10 = arith.constant 0 : index
    %16 = vector.load %arg7[%c0_8, %c0_9, %c0_10] : memref<1x8x32xbf16, #tpu.memory_space<vmem>>, vector<1x8x32xbf16>
    %cst_11 = arith.constant dense<0.000000e+00> : vector<1x8x32xf32>
    %17 = tpu.matmul %15, %16, %cst_11 {dimension_numbers = #tpu.dot_dimension_numbers<[2], [1], [1], [2], [0, 0, 0, 1, 1, 2], [0], [0]>} : vector<1x8x8xbf16>, vector<1x8x32xbf16>, vector<1x8x32xf32> -> vector<1x8x32xf32>
    %18 = vector.broadcast %14 : vector<1x8x1xf32> to vector<1x8x32xf32>
    %19 = arith.divf %17, %18 : vector<1x8x32xf32>
    %c0_12 = arith.constant 0 : index
    %c0_13 = arith.constant 0 : index
    %20 = vector.load %arg5[%c0_12, %c0_13] : memref<1x32xf32, #tpu.memory_space<vmem>>, vector<1x32xf32>
    %21 = vector.shape_cast %20 : vector<1x32xf32> to vector<1x1x32xf32>
    %22 = vector.broadcast %21 : vector<1x1x32xf32> to vector<1x8x32xf32>
    %23 = arith.addf %19, %22 : vector<1x8x32xf32>
    %c0_14 = arith.constant 0 : index
    %c0_15 = arith.constant 0 : index
    %c0_16 = arith.constant 0 : index
    %24 = vector.load %arg6[%c0_14, %c0_15, %c0_16] : memref<1x8x32xf32, #tpu.memory_space<vmem>>, vector<1x8x32xf32>
    tpu.vector_store %arg6[%c0_14, %c0_15, %c0_16], %23 {strides = array<i32>} : memref<1x8x32xf32, #tpu.memory_space<vmem>>, vector<1x8x32xf32>,
    return
  }
  func.func @transform_0(%arg0: i32, %arg1: i32) -> (i32, i32, i32) {
    %c0_i32 = arith.constant 0 : i32
    %c0_i32_0 = arith.constant 0 : i32
    %c0_i32_1 = arith.constant 0 : i32
    return %arg0, %c0_i32, %c0_i32_0 : i32, i32, i32
  }
  func.func @transform_1(%arg0: i32, %arg1: i32) -> (i32, i32, i32) {
    %c0_i32 = arith.constant 0 : i32
    %c0_i32_0 = arith.constant 0 : i32
    return %arg0, %arg1, %c0_i32 : i32, i32, i32
  }
  func.func @transform_2(%arg0: i32, %arg1: i32) -> (i32, i32) {
    %c0_i32 = arith.constant 0 : i32
    %c0_i32_0 = arith.constant 0 : i32
    %c0_i32_1 = arith.constant 0 : i32
    return %c0_i32, %c0_i32_0 : i32, i32
  }
  func.func @transform_3(%arg0: i32, %arg1: i32) -> (i32, i32) {
    %c0_i32 = arith.constant 0 : i32
    %c0_i32_0 = arith.constant 0 : i32
    %c0_i32_1 = arith.constant 0 : i32
    return %c0_i32, %c0_i32_0 : i32, i32
  }
  func.func @transform_4(%arg0: i32, %arg1: i32) -> (i32, i32, i32) {
    %c0_i32 = arith.constant 0 : i32
    %c0_i32_0 = arith.constant 0 : i32
    return %arg0, %arg1, %c0_i32 : i32, i32, i32
  }
}

</mosaic_0001>

<bundles_post_ra>
// kernel: tpu_custom_call.1
= control target key start
LH: loop header
LB: loop body
LE: loop exit
PB: predicated region body
PF: predicated region fallthrough
CT: control target
= control target key end

     0   :  { %s1199_s0 = inlined_call_operand.hbm [shape: f32[2,8,32], index: 0, kind: input, shape index: {}]   ;;  %s1200_s1 = inlined_call_operand.hbm [shape: f32[2,8,32], index: 1, kind: input, shape index: {}]   ;;  %s1201_s2 = inlined_call_operand.hbm [shape: f32[32,32], index: 2, kind: input, shape index: {}]   ;;  %s1202_s3 = inlined_call_operand.vmem [shape: f32[1,32], index: 3, kind: input, shape index: {}]   ;;  %s1203_s4 = inlined_call_operand.hbm [shape: f32[2,8,32], index: 4, kind: output, shape index: {}]  }
   0x1   :  { %1210 = sst [smem:[#allocation16_spill]] %s1201_s2 }
   0x2   :  { %9 = vsyncpa [#allocation4], 0 }
   0x3   :  { %11 = vsyncpa [#allocation4 + $0x1], 0 }
   0x4   :  { %12 = vsyncpa [#allocation7], 0 }
   0x5   :  { %14 = vsyncpa [#allocation7 + $0x1], 0 }
   0x6   :  { %15 = vsyncpa [#allocation5], 0 }
   0x7   :  { %17 = vsyncpa [#allocation5 + $0x1], 0  ;;  %s935_s15 = smov 0   ;;  %s937_s16 = smov 0  }
   0x8   :  { %s939_s17 = smov 0   ;;  %s941_s18 = smov 0  }
   0x9   :  { %s943_s19 = smov 0   ;;  %s945_s20 = smov 0  }
   0xa LB: > { %1211 = sst [smem:[#allocation14_spill]] %s896_s19  ;;  %s966_s21 = sadd.s32 4294967295, %s900_s20   ;;  %s900_s20 = sphi %s945_s20, %s23_s20   ;;  %s896_s19 = sphi %s943_s19, %s1230_s19   ;;  %s892_s18 = sphi %s941_s18, %s1229_s18   ;;  %s888_s17 = sphi %s939_s17, %s1233_s17   ;;  %s884_s16 = sphi %s937_s16, %s1232_s16   ;;  %s880_s15 = sphi %s935_s15, %s1231_s15  }
   0xb   : > { %s588_s22 = sadd.s32 4294967294, %s900_s20   ;;  %p55_p0 = scmp.ne.s32.totalorder %s884_s16, %s880_s15 }
   0xc   : > { %p1204_p1 = scmp.eq.s32.totalorder %s966_s21, 0  ;;  %p157_p3 = scmp.eq.s32.totalorder %s588_s22, 1 }
   0xd   : > { %p589_p5 = scmp.ge.s32.totalorder %s900_s20, 1  ;;  %p164_p7 = scmp.lt.s32.totalorder %s900_s20, 3 }
   0xe   : > { %p975_p4 = por %p1204_p1, %p55_p0  ;;  %p980_p6 = por %p157_p3, %p55_p0 }
   0xf   : > { %p985_p8 = pnand %p589_p5, %p164_p7  ;;  %s902_s26 = smov [#allocation8]  }
  0x10   : > { %s1212_s23 = scalar_select %p975_p4, 1, 0 }
  0x11   : > { %s1213_s24 = scalar_select %p980_p6, 1, 0 }
  0x12   : > { %s1214_s25 = scalar_select %p985_p8, 1, 0 }
  0x13   : > { %s176_s27 = sshll.u32 %s902_s26, 4  ;;  %p646_p9 = pneg %p985_p8  ;;  %s177_s27 = int_to_ptr.vmem [resolvable:$true] %s176_s27 }
  0x14   : > { %s35_s29 = sadd.s32 1, %s896_s19  ;;  %s1216_s2 = sld [smem:[#allocation16_spill]] }
  0x15   : > { %p994_p11 = pnand %p646_p9, %p1204_p1 }
  0x17   : > { %p724_p13 = pneg %p994_p11 }
  0x1a   : > { %s722_s6 = scalar_lea.hbm %s1216_s2, 512 }
  0x1b   : > { %p723_p12 = scmp.ne.s32.totalorder %s1216_s2, %s722_s6  ;;  %p729_p5 = scmp.lt.u32.totalorder %s722_s6, %s1216_s2 }
  0x1d   : > { %p725_p0 = pnand %p724_p13, %p723_p12 }
  0x1f   : > { %p726_p3 = pneg %p725_p0 }
  0x21   : > { %p731_p7 = pnand %p729_p5, %p726_p3 }
  0x23   : > { %734 = shalt.err (!%p731_p7)
}
  0x24   : > { %s735_s11 = scalar_lea.vmem %s177_s27, 512  ;;  %p743_p2 = scmp.lt.s32.totalorder %s177_s27, %s177_s27 }
  0x25   : > { %p736_p9 = scmp.ne.s32.totalorder %s177_s27, %s735_s11  ;;  %p744_p6 = scmp.lt.s32.totalorder %s735_s11, %s735_s11 }
  0x27   : > { %p738_p10 = pnand %p736_p9, %p724_p13  ;;  %p745_p4 = por %p744_p6, %p743_p2 }
  0x29   : > { %p739_p1 = pneg %p738_p10 }
  0x2b   : > { %p746_p8 = pnand %p745_p4, %p739_p1 }
  0x2d   : > { %749 = shalt.err (!%p746_p8)
}
  0x2e   : > { %s903_s12 = smov 128   ;;  %s904_s13 = smov 8  }
  0x2f   : > { %649 = dma.hbm_to_vmem [thread:$0]  (!%p994_p11), %s1216_s2, 512, %s177_s27, [#allocation7], %s903_s12, %s903_s12, %s904_s13  }
  0x30   : > { %p37_p1 = scmp.ge.s32.totalorder %s35_s29, 2  ;;  %s42_s26 = sadd.s32 1, %s888_s17 }
  0x31   : > { %p49_p2 = scmp.ne.s32.totalorder %s888_s17, %s884_s16  ;;  %p50_p4 = scmp.eq.s32.totalorder %s900_s20, 0 }
  0x32   : > { %s1235_s29 = smov (%p37_p1, %s35_s29), 0  ;;  %p1219_p8 = scmp.eq.s32.totalorder %s966_s21, 1 }
  0x33   : > { %1217 = sst [smem:[#allocation15_spill]] %s1235_s29  ;;  %p1021_p6 = por %p50_p4, %p49_p2 }
  0x34   : > { %p1027_p10 = por %p1219_p8, %p49_p2  ;;  %s39_s5 = ssub.s32 %s896_s19, %s1235_s29 }
  0x35   : > { %p662_p11 = scmp.lt.s32.totalorder %s900_s20, 2  ;;  %p40_p12 = scmp.eq.s32.totalorder %s39_s5, 0 }
  0x36   : > { %s1220_s28 = scalar_select %p1027_p10, 1, 0 }
  0x37   : > { %s193_s27 = sand.u32 1, %s888_s17   ;;  %s593_s8 = sshll.u32 %s896_s19, 7 }
  0x38   : > { %s1035_s6 = sshll.u32 %s193_s27, 3  ;;  %s1044_s11 = scalar_lea.hbm %s1199_s0, %s593_s8 }
  0x39   : > { %s1038_s7 = scalar_select %p40_p12, %s888_s17, %s42_s26  }
  0x3a   : > { %s197_s12 = scalar_lea.vmem [#allocation3], %s1035_s6  ;;  %p1051_p13 = pnand %p662_p11, %p1021_p6 }
  0x3b   : > { %s204_s13 = sshll.u32 %s197_s12, 4  ;;  %s1058_s5 = scalar_lea.hbm %s1200_s1, %s593_s8  ;;  %s1047_s13 = int_to_ptr.vmem [resolvable:$true] %s204_s13 }
  0x3c   : > { %s211_s9 = sand.u32 1, %s900_s20   ;;  %s194_s10 = scalar_lea.sflag [#allocation4], %s193_s27 }
  0x3d   : > { %s750_s2 = scalar_lea.hbm %s1044_s11, 128  ;;  %p752_p3 = pneg %p1051_p13 }
  0x3e   : > { %p751_p0 = scmp.ne.s32.totalorder %s1044_s11, %s750_s2  ;;  %s755_s29 = scalar_lea.hbm %s1199_s0, 256 }
  0x3f   : > { %p756_p9 = scmp.lt.u32.totalorder %s1044_s11, %s1199_s0  ;;  %p757_p1 = scmp.lt.u32.totalorder %s755_s29, %s750_s2 }
  0x40   : > { %p753_p5 = pnand %p752_p3, %p751_p0  ;;  %p759_p4 = scmp.lt.u32.totalorder %s750_s2, %s1044_s11 }
  0x41   : > { %p758_p2 = por %p757_p1, %p756_p9 }
  0x42   : > { %p754_p7 = pneg %p753_p5 }
  0x43   : > { %p760_p6 = por %p759_p4, %p758_p2 }
  0x45   : > { %p761_p8 = pnand %p760_p6, %p754_p7 }
  0x47   : > { %764 = shalt.err (!%p761_p8)
}
  0x48   : > { %s765_s27 = scalar_lea.vmem %s1047_s13, 128  ;;  %s905_s8 = smov [#allocation3]  }
  0x49   : > { %p766_p11 = scmp.ne.s32.totalorder %s1047_s13, %s765_s27  ;;  %s770_s26 = sshll.u32 %s905_s8, 4  ;;  %s771_s26 = int_to_ptr.vmem [resolvable:$false] %s770_s26 }
  0x4a   : > { %s772_s19 = scalar_lea.vmem %s771_s26, 256  ;;  %p773_p5 = scmp.lt.s32.totalorder %s1047_s13, %s771_s26 }
  0x4b   : > { %p768_p12 = pnand %p766_p11, %p752_p3  ;;  %p774_p9 = scmp.lt.s32.totalorder %s772_s19, %s765_s27 }
  0x4d   : > { %p769_p0 = pneg %p768_p12  ;;  %p775_p1 = por %p774_p9, %p773_p5 }
  0x4f   : > { %p776_p2 = pnand %p775_p1, %p769_p0 }
  0x51   : > { %779 = shalt.err (!%p776_p2)
}
  0x52   : > { %653 = dma.hbm_to_vmem [thread:$0]  (!%p1051_p13), %s1044_s11, 128, %s1047_s13, %s194_s10  }
  0x53   : > { %s215_s2 = scalar_lea.vmem [#allocation6], %s1035_s6  ;;  %s212_s30 = scalar_lea.sflag [#allocation7], %s211_s9 }
  0x54   : > { %s223_s29 = sshll.u32 %s215_s2, 4  ;;  %s780_s12 = scalar_lea.hbm %s1058_s5, 128  ;;  %s224_s29 = int_to_ptr.vmem [resolvable:$true] %s223_s29 }
  0x55   : > { %p781_p7 = scmp.ne.s32.totalorder %s1058_s5, %s780_s12  ;;  %s785_s8 = scalar_lea.hbm %s1200_s1, 256 }
  0x56   : > { %p786_p8 = scmp.lt.u32.totalorder %s1058_s5, %s1200_s1  ;;  %p787_p11 = scmp.lt.u32.totalorder %s785_s8, %s780_s12 }
  0x57   : > { %p783_p4 = pnand %p781_p7, %p752_p3  ;;  %p789_p0 = scmp.lt.u32.totalorder %s780_s12, %s1058_s5 }
  0x58   : > { %p788_p12 = por %p787_p11, %p786_p8 }
  0x59   : > { %p784_p6 = pneg %p783_p4 }
  0x5a   : > { %p790_p5 = por %p789_p0, %p788_p12 }
  0x5c   : > { %p791_p9 = pnand %p790_p5, %p784_p6 }
  0x5e   : > { %794 = shalt.err (!%p791_p9)
}
  0x5f   : > { %s795_s6 = scalar_lea.vmem %s224_s29, 128  ;;  %s906_s11 = smov [#allocation6]  }
  0x60   : > { %p796_p1 = scmp.ne.s32.totalorder %s224_s29, %s795_s6  ;;  %s800_s13 = sshll.u32 %s906_s11, 4  ;;  %s801_s13 = int_to_ptr.vmem [resolvable:$false] %s800_s13 }
  0x61   : > { %s802_s9 = scalar_lea.vmem %s801_s13, 256  ;;  %p803_p4 = scmp.lt.s32.totalorder %s224_s29, %s801_s13 }
  0x62   : > { %p798_p2 = pnand %p796_p1, %p752_p3  ;;  %p804_p10 = scmp.lt.s32.totalorder %s802_s9, %s795_s6 }
  0x64   : > { %p799_p7 = pneg %p798_p2  ;;  %p805_p8 = por %p804_p10, %p803_p4 }
  0x66   : > { %p806_p11 = pnand %p805_p8, %p799_p7 }
  0x68   : > { %809 = shalt.err (!%p806_p11)
}
  0x69   : > { %656 = dma.hbm_to_vmem [thread:$0]  (!%p1051_p13), %s1058_s5, 128, %s224_s29, %s212_s30  }
  0x6a   : > { %p1222_p6 = scmp.ne.s32.totalorder %s1214_s25, 0 }
  0x6b   : > { %s1111_s10 = sand.u32 (!%p1222_p6), 1, %s884_s16   ;;  %p1223_p10 = scmp.ne.s32.totalorder (!%p1222_p6), %s1212_s23, 0 }
  0x6c   : > { %232 = sbr.rel (%p1222_p6) target bundleno = 735 (0x2df), region = 36  ;;  %s1114_s2 = sshll.u32 (!%p1222_p6), %s1111_s10, 3 }
  0x6d   : > { %s235_s12 = scalar_lea.sflag (!%p1222_p6), [#allocation4], %s1111_s10  ;;  %s238_s22 = scalar_lea.vmem (!%p1222_p6), [#allocation3], %s1114_s2 }
  0x73   : > { %863 = dma.done.wait (%p1223_p10), %s235_s12, 128  }
  0x74   : > { %865 = vsyncadd (%p1223_p10), %s235_s12, 4294967168  ;;  %s243_s25 = sand.u32 1, %s966_s21   ;;  %s247_s5 = scalar_lea.vmem [#allocation6], %s1114_s2 }
  0x75   : > { %s244_s14 = scalar_lea.sflag [#allocation7], %s243_s25 }
  0x76   : > { %867 = dma.done.wait (%p1223_p10), %s244_s14, 128  }
  0x77   : > { %869 = vsyncadd (%p1223_p10), %s244_s14, 4294967168  ;;  %p1224_p13 = scmp.eq.s32.totalorder %s966_s21, 0 }
  0x79   : > { %871 = dma.done.wait (%p1224_p13), [#allocation7], 512   ;;  %p1225_p3 = pmov %p1224_p13 }
  0x7a   : > { %v907_v0 = vmov 0.0   ;;  %vm908_vm0 = vmmov 0   ;;  %v282_v1 = vld [vmem:[%s238_s22] sm:$0xff]  ;;  %vm294_vm1 = vcmask 261120   ;;  %v290_v5 = vld [vmem:[#allocation8 + $0x10] sm:$0xff]  ;;  %v291_v6 = vld [vmem:[#allocation8 + $0x18] sm:$0xff] }
  0x7b   : > { %873 = vsyncadd (%p1225_p3), [#allocation7], 4294966784  ;;  %624 = vmatprep.subr.bf16.mxu1 %v907_v0  ;;  %626 = vmatprep.mubr.msk.bf16.mxu1 %vm908_vm0, %v907_v0  ;;  %v288_v2 = vld [vmem:[#allocation8] sm:$0xff]  ;;  %v283_v3 = vpack.c.bf16 %v282_v1, %v282_v1  ;;  %v289_v4 = vld [vmem:[#allocation8 + $0x8] sm:$0xff]  ;;  %v293_v10 = vpack.c.bf16 %v291_v6, %v290_v5  ;;  %vm390_vm2 = vcmask 64512   ;;  %vm339_vm3 = vcmask 257024  }
  0x7c   : > { %616 = vmatprep.subr.bf16.mxu0 %v907_v0  ;;  %620 = vmatprep.mubr.msk.bf16.mxu0 %vm908_vm0, %v907_v0  ;;  %v292_v7 = vpack.c.bf16 %v289_v4, %v288_v2  ;;  %v341_v9 = vld [vmem:[%s247_s5] sm:$0xff]  ;;  %vm405_vm4 = vcmask 1043456   ;;  %s606_s29 = sshll.u32 %s892_s18, 7  ;;  %s280_s30 = scalar_lea.vmem [#allocation9], %s1114_s2 }
  0x7d   : > { %v348_v8 = vsel %vm294_vm1, %v283_v3, 0  ;;  %v342_v11 = vpack.c.bf16 %v341_v9, %v341_v9  ;;  %v604_v33 = vld [vmem:[%s1202_s3] ss:$0 sm:$0xff]  ;;  %s475_s27 = sshll.u32 %s280_s30, 4  ;;  %s1149_s19 = scalar_lea.hbm %s1203_s4, %s606_s29  ;;  %s1151_s27 = int_to_ptr.vmem [resolvable:$true] %s475_s27 }
  0x7e   : > { %625 = vmatpush3.bf16.xpose.msra.mxu1 %v348_v8  ;;  %617 = vmatpush3.bf16.msra.mxu0 %v292_v7  ;;  %s461_s18 = scalar_lea.sflag [#allocation5], %s1111_s10  ;;  %s810_s6 = scalar_lea.vmem %s1151_s27, 128 }
  0x7f   : > { %618 = vmatprep.subr.bf16.mxu0 %v907_v0  ;;  %p811_p12 = scmp.ne.s32.totalorder %s1151_s27, %s810_s6  ;;  %p1226_p0 = scmp.ne.s32.totalorder %s1220_s28, 0 }
  0x80   : > { %s909_s11 = smov [#allocation9]  }
  0x81   : > { %p812_p5 = pnand %p811_p12, %p1226_p0  ;;  %s814_s13 = sshll.u32 %s909_s11, 4  ;;  %s815_s13 = int_to_ptr.vmem [resolvable:$false] %s814_s13 }
  0x82   : > { %619 = vmatpush3.bf16.msra.mxu0 %v293_v10  ;;  %s816_s9 = scalar_lea.vmem %s815_s13, 256  ;;  %p817_p1 = scmp.lt.s32.totalorder %s1151_s27, %s815_s13 }
  0x83   : > { %630 = vmatprep.subr.bf16.mxu0 %v907_v0  ;;  %p813_p9 = pneg %p812_p5  ;;  %p818_p2 = scmp.lt.s32.totalorder %s816_s9, %s810_s6 }
  0x85   : > { %627 = vmatmul.mubr.msk.bf16.vlgmr.msra.gmra.mrb[0].mxu1 %vm294_vm1, %v342_v11  ;;  %621 = vmatmul.mubr.msk.bf16.vlgmr.msra.gmra.mrb[0].mxu0 %vm294_vm1, %v283_v3  ;;  %p819_p7 = por %p818_p2, %p817_p1 }
  0x86   : > { %632 = vmatprep.mubr.msk.bf16.mxu0 %vm908_vm0, %v907_v0 }
  0x87   : > { %p820_p4 = pnand %p819_p7, %p813_p9 }
 0x158   : > { %v384_v12 = vpop.f32.mrb[0].mxu1  ;;  %v332_v13 = vpop.f32.mrb[0].mxu0 }
 0x159   : > { %v628_v14 = vpop.f32.mrb[1].mxu1  ;;  %v391_v15 = vsel %vm390_vm2, %v384_v12, -inf  ;;  %v338_v16 = vpack.c.bf16 %v332_v13, %v332_v13  ;;  %v622_v17 = vpop.f32.mrb[1].mxu0 }
 0x15a   : > { %392 = vmax.xlane.f32.xlu0 %v391_v15  ;;  %v387_v18 = vpop.f32.mrb[2].mxu1  ;;  %v335_v19 = vpop.f32.mrb[2].mxu0 }
 0x15b   : > { %v629_v20 = vpop.f32.mrb[3].mxu1  ;;  %340 = vst.msk [vmem:[#allocation2] sm:$0xf] %vm339_vm3, %v338_v16  ;;  %v623_v21 = vpop.f32.mrb[3].mxu0 }
 0x162   : > { %v401_v22 = vld [vmem:[#allocation2] sm:$0xf] }
 0x163   : > { %v407_v23 = vsel %vm405_vm4, %v401_v22, 0 }
 0x164   : > { %631 = vmatpush3.bf16.msra.mxu0 %v407_v23 }
 0x1e7   : > { %v393_v24 = vpop.xlane.xlu0 %392 }
 0x1e8   : > { %v394_v25 = vsub.f32 %v384_v12, %v393_v24 }
 0x1ea   : > { %v395_v26 = vmul.f32 1.442695, %v394_v25 }
 0x1ec   : > { %718 = vpow2.f32 %v395_v26 }
 0x1f6   : > { %v719_v27 = vpop.eup %718 }
 0x1f7   : > { %v397_v28 = vsel %vm390_vm2, %v719_v27, 0.0  ;;  %v400_v29 = vpack.c.bf16 %v719_v27, %v719_v27 }
 0x1f8   : > { %398 = vadd.xlane.f32.xlu0 %v397_v28 }
 0x1f9   : > { %633 = vmatmul.mubr.msk.bf16.vlgmr.msra.gmra.mrb[4].mxu0 %vm390_vm2, %v400_v29 }
 0x285   : > { %v399_v30 = vpop.xlane.xlu0 %398 }
 0x286   : > { %720 = vrcp.f32 %v399_v30 }
 0x290   : > { %v721_v31 = vpop.eup %720 }
 0x2cc   : > { %v443_v32 = vpop.f32.mrb[4].mxu0 }
 0x2cd   : > { %v450_v34 = vmul.f32 %v721_v31, %v443_v32  ;;  %v634_v35 = vpop.f32.mrb[5].mxu0 }
 0x2ce   : > { %v446_v36 = vpop.f32.mrb[6].mxu0 }
 0x2cf   : > { %v458_v37 = vadd.f32 %v604_v33, %v450_v34  ;;  %v635_v38 = vpop.f32.mrb[7].mxu0 }
 0x2d1   : > { %459 = vst.msk [vmem:[%s280_s30] sm:$0xff] %vm294_vm1, %v458_v37 }
 0x2d2   : > { %823 = shalt.err (!%p820_p4)
}
 0x2d3   : > { %s824_s10 = scalar_lea.hbm %s1149_s19, 128  ;;  %s828_s22 = scalar_lea.hbm %s1203_s4, 256 }
 0x2d4   : > { %p825_p8 = scmp.ne.s32.totalorder %s1149_s19, %s824_s10  ;;  %p829_p10 = scmp.lt.u32.totalorder %s1149_s19, %s1203_s4 }
 0x2d5   : > { %p830_p13 = scmp.lt.u32.totalorder %s828_s22, %s824_s10  ;;  %p832_p12 = scmp.lt.u32.totalorder %s824_s10, %s1149_s19 }
 0x2d6   : > { %p826_p11 = pnand %p825_p8, %p1226_p0 }
 0x2d7   : > { %p831_p3 = por %p830_p13, %p829_p10 }
 0x2d8   : > { %p827_p6 = pneg %p826_p11 }
 0x2d9   : > { %p833_p5 = por %p832_p12, %p831_p3 }
 0x2db   : > { %p834_p9 = pnand %p833_p5, %p827_p6 }
 0x2dd   : > { %837 = shalt.err (!%p834_p9)
}
 0x2de   : > { %644 = dma.vmem_to_hbm [thread:$0]  (%p1226_p0), %s1151_s27, 128, %s1149_s19, %s461_s18  }
 0x2df PF: > { %s487_s5 = sand.u32 1, %s880_s15   ;;  %p1227_p1 = scmp.ne.s32.totalorder %s1213_s24, 0 }
 0x2e0   : > { %p1228_p2 = scmp.ge.s32.totalorder %s900_s20, 2  ;;  %s488_s21 = scalar_lea.sflag [#allocation5], %s487_s5 }
 0x2e2   : > { %p658_p7 = pnand %p1228_p2, %p1227_p1 }
 0x2e4   : > { %875 = dma.done.wait (!%p658_p7), %s488_s21, 128  }
 0x2e5   : > { %877 = vsyncadd (!%p658_p7), %s488_s21, 4294967168  ;;  %s23_s20 = sadd.s32 1, %s900_s20   ;;  %s1229_s18 = sld [smem:[#allocation14_spill]] }
 0x2e6   : > { %p20_p4 = scmp.ge.s32.totalorder %s23_s20, 4   ;;  %s1230_s19 = sld [smem:[#allocation15_spill]] }
 0x2e7   : > { %s1231_s15 = smov %s884_s16  ;;  %s1232_s16 = smov %s888_s17 }
 0x2e8   : > { %s1233_s17 = smov %s1038_s7  ;;  %22 = sbr.rel (!%p20_p4) target bundleno = 10 (0xa), region = 102 }
 0x2ef   :  { %493 = vsyncpa [#allocation4], 1 }
 0x2f0   :  { %495 = vsyncpa [#allocation4 + $0x1], 1 }
 0x2f1   :  { %496 = vsyncpa [#allocation7], 1 }
 0x2f2   :  { %498 = vsyncpa [#allocation7 + $0x1], 1 }
 0x2f3   :  { %499 = vsyncpa [#allocation5], 1 }
 0x2f4   :  { %501 = vsyncpa [#allocation5 + $0x1], 1 }

// kernel: tpu_custom_call.1
= control target key start
LH: loop header
LB: loop body
LE: loop exit
PB: predicated region body
PF: predicated region fallthrough
CT: control target
= control target key end

     0   :  { %s1199_s0 = inlined_call_operand.hbm [shape: f32[2,8,32], index: 0, kind: input, shape index: {}]   ;;  %s1200_s1 = inlined_call_operand.hbm [shape: f32[2,8,32], index: 1, kind: input, shape index: {}]   ;;  %s1201_s2 = inlined_call_operand.hbm [shape: f32[32,32], index: 2, kind: input, shape index: {}]   ;;  %s1202_s3 = inlined_call_operand.vmem [shape: f32[1,32], index: 3, kind: input, shape index: {}]   ;;  %s1203_s4 = inlined_call_operand.hbm [shape: f32[2,8,32], index: 4, kind: output, shape index: {}]  }
   0x1   :  { %1210 = sst [smem:[#allocation16_spill]] %s1201_s2 }
   0x2   :  { %9 = vsyncpa [#allocation4], 0 }
   0x3   :  { %11 = vsyncpa [#allocation4 + $0x1], 0 }
   0x4   :  { %12 = vsyncpa [#allocation7], 0 }
   0x5   :  { %14 = vsyncpa [#allocation7 + $0x1], 0 }
   0x6   :  { %15 = vsyncpa [#allocation5], 0 }
   0x7   :  { %17 = vsyncpa [#allocation5 + $0x1], 0  ;;  %s935_s15 = smov 0   ;;  %s937_s16 = smov 0  }
   0x8   :  { %s939_s17 = smov 0   ;;  %s941_s18 = smov 0  }
   0x9   :  { %s943_s19 = smov 0   ;;  %s945_s20 = smov 0  }
   0xa LB: > { %1211 = sst [smem:[#allocation14_spill]] %s896_s19  ;;  %s966_s21 = sadd.s32 4294967295, %s900_s20   ;;  %s900_s20 = sphi %s945_s20, %s23_s20   ;;  %s896_s19 = sphi %s943_s19, %s1230_s19   ;;  %s892_s18 = sphi %s941_s18, %s1229_s18   ;;  %s888_s17 = sphi %s939_s17, %s1233_s17   ;;  %s884_s16 = sphi %s937_s16, %s1232_s16   ;;  %s880_s15 = sphi %s935_s15, %s1231_s15  }
   0xb   : > { %s588_s22 = sadd.s32 4294967294, %s900_s20   ;;  %p55_p0 = scmp.ne.s32.totalorder %s884_s16, %s880_s15 }
   0xc   : > { %p1204_p1 = scmp.eq.s32.totalorder %s966_s21, 0  ;;  %p157_p3 = scmp.eq.s32.totalorder %s588_s22, 1 }
   0xd   : > { %p589_p5 = scmp.ge.s32.totalorder %s900_s20, 1  ;;  %p164_p7 = scmp.lt.s32.totalorder %s900_s20, 3 }
   0xe   : > { %p975_p4 = por %p1204_p1, %p55_p0  ;;  %p980_p6 = por %p157_p3, %p55_p0 }
   0xf   : > { %p985_p8 = pnand %p589_p5, %p164_p7  ;;  %s902_s26 = smov [#allocation8]  }
  0x10   : > { %s1212_s23 = scalar_select %p975_p4, 1, 0 }
  0x11   : > { %s1213_s24 = scalar_select %p980_p6, 1, 0 }
  0x12   : > { %s1214_s25 = scalar_select %p985_p8, 1, 0 }
  0x13   : > { %s176_s27 = sshll.u32 %s902_s26, 4  ;;  %p646_p9 = pneg %p985_p8  ;;  %s177_s27 = int_to_ptr.vmem [resolvable:$true] %s176_s27 }
  0x14   : > { %s35_s29 = sadd.s32 1, %s896_s19  ;;  %s1216_s2 = sld [smem:[#allocation16_spill]] }
  0x15   : > { %p994_p11 = pnand %p646_p9, %p1204_p1 }
  0x17   : > { %p724_p13 = pneg %p994_p11 }
  0x1a   : > { %s722_s6 = scalar_lea.hbm %s1216_s2, 512 }
  0x1b   : > { %p723_p12 = scmp.ne.s32.totalorder %s1216_s2, %s722_s6  ;;  %p729_p5 = scmp.lt.u32.totalorder %s722_s6, %s1216_s2 }
  0x1d   : > { %p725_p0 = pnand %p724_p13, %p723_p12 }
  0x1f   : > { %p726_p3 = pneg %p725_p0 }
  0x21   : > { %p731_p7 = pnand %p729_p5, %p726_p3 }
  0x23   : > { %734 = shalt.err (!%p731_p7)
}
  0x24   : > { %s735_s11 = scalar_lea.vmem %s177_s27, 512  ;;  %p743_p2 = scmp.lt.s32.totalorder %s177_s27, %s177_s27 }
  0x25   : > { %p736_p9 = scmp.ne.s32.totalorder %s177_s27, %s735_s11  ;;  %p744_p6 = scmp.lt.s32.totalorder %s735_s11, %s735_s11 }
  0x27   : > { %p738_p10 = pnand %p736_p9, %p724_p13  ;;  %p745_p4 = por %p744_p6, %p743_p2 }
  0x29   : > { %p739_p1 = pneg %p738_p10 }
  0x2b   : > { %p746_p8 = pnand %p745_p4, %p739_p1 }
  0x2d   : > { %749 = shalt.err (!%p746_p8)
}
  0x2e   : > { %s903_s12 = smov 128   ;;  %s904_s13 = smov 8  }
  0x2f   : > { %649 = dma.hbm_to_vmem [thread:$0]  (!%p994_p11), %s1216_s2, 512, %s177_s27, [#allocation7], %s903_s12, %s903_s12, %s904_s13  }
  0x30   : > { %p37_p1 = scmp.ge.s32.totalorder %s35_s29, 2  ;;  %s42_s26 = sadd.s32 1, %s888_s17 }
  0x31   : > { %p49_p2 = scmp.ne.s32.totalorder %s888_s17, %s884_s16  ;;  %p50_p4 = scmp.eq.s32.totalorder %s900_s20, 0 }
  0x32   : > { %s1235_s29 = smov (%p37_p1, %s35_s29), 0  ;;  %p1219_p8 = scmp.eq.s32.totalorder %s966_s21, 1 }
  0x33   : > { %1217 = sst [smem:[#allocation15_spill]] %s1235_s29  ;;  %p1021_p6 = por %p50_p4, %p49_p2 }
  0x34   : > { %p1027_p10 = por %p1219_p8, %p49_p2  ;;  %s39_s5 = ssub.s32 %s896_s19, %s1235_s29 }
  0x35   : > { %p662_p11 = scmp.lt.s32.totalorder %s900_s20, 2  ;;  %p40_p12 = scmp.eq.s32.totalorder %s39_s5, 0 }
  0x36   : > { %s1220_s28 = scalar_select %p1027_p10, 1, 0 }
  0x37   : > { %s193_s27 = sand.u32 1, %s888_s17   ;;  %s593_s8 = sshll.u32 %s896_s19, 7 }
  0x38   : > { %s1035_s6 = sshll.u32 %s193_s27, 3  ;;  %s1044_s11 = scalar_lea.hbm %s1199_s0, %s593_s8 }
  0x39   : > { %s1038_s7 = scalar_select %p40_p12, %s888_s17, %s42_s26  }
  0x3a   : > { %s197_s12 = scalar_lea.vmem [#allocation3], %s1035_s6  ;;  %p1051_p13 = pnand %p662_p11, %p1021_p6 }
  0x3b   : > { %s204_s13 = sshll.u32 %s197_s12, 4  ;;  %s1058_s5 = scalar_lea.hbm %s1200_s1, %s593_s8  ;;  %s1047_s13 = int_to_ptr.vmem [resolvable:$true] %s204_s13 }
  0x3c   : > { %s211_s9 = sand.u32 1, %s900_s20   ;;  %s194_s10 = scalar_lea.sflag [#allocation4], %s193_s27 }
  0x3d   : > { %s750_s2 = scalar_lea.hbm %s1044_s11, 128  ;;  %p752_p3 = pneg %p1051_p13 }
  0x3e   : > { %p751_p0 = scmp.ne.s32.totalorder %s1044_s11, %s750_s2  ;;  %s755_s29 = scalar_lea.hbm %s1199_s0, 256 }
  0x3f   : > { %p756_p9 = scmp.lt.u32.totalorder %s1044_s11, %s1199_s0  ;;  %p757_p1 = scmp.lt.u32.totalorder %s755_s29, %s750_s2 }
  0x40   : > { %p753_p5 = pnand %p752_p3, %p751_p0  ;;  %p759_p4 = scmp.lt.u32.totalorder %s750_s2, %s1044_s11 }
  0x41   : > { %p758_p2 = por %p757_p1, %p756_p9 }
  0x42   : > { %p754_p7 = pneg %p753_p5 }
  0x43   : > { %p760_p6 = por %p759_p4, %p758_p2 }
  0x45   : > { %p761_p8 = pnand %p760_p6, %p754_p7 }
  0x47   : > { %764 = shalt.err (!%p761_p8)
}
  0x48   : > { %s765_s27 = scalar_lea.vmem %s1047_s13, 128  ;;  %s905_s8 = smov [#allocation3]  }
  0x49   : > { %p766_p11 = scmp.ne.s32.totalorder %s1047_s13, %s765_s27  ;;  %s770_s26 = sshll.u32 %s905_s8, 4  ;;  %s771_s26 = int_to_ptr.vmem [resolvable:$false] %s770_s26 }
  0x4a   : > { %s772_s19 = scalar_lea.vmem %s771_s26, 256  ;;  %p773_p5 = scmp.lt.s32.totalorder %s1047_s13, %s771_s26 }
  0x4b   : > { %p768_p12 = pnand %p766_p11, %p752_p3  ;;  %p774_p9 = scmp.lt.s32.totalorder %s772_s19, %s765_s27 }
  0x4d   : > { %p769_p0 = pneg %p768_p12  ;;  %p775_p1 = por %p774_p9, %p773_p5 }
  0x4f   : > { %p776_p2 = pnand %p775_p1, %p769_p0 }
  0x51   : > { %779 = shalt.err (!%p776_p2)
}
  0x52   : > { %653 = dma.hbm_to_vmem [thread:$0]  (!%p1051_p13), %s1044_s11, 128, %s1047_s13, %s194_s10  }
  0x53   : > { %s215_s2 = scalar_lea.vmem [#allocation6], %s1035_s6  ;;  %s212_s30 = scalar_lea.sflag [#allocation7], %s211_s9 }
  0x54   : > { %s223_s29 = sshll.u32 %s215_s2, 4  ;;  %s780_s12 = scalar_lea.hbm %s1058_s5, 128  ;;  %s224_s29 = int_to_ptr.vmem [resolvable:$true] %s223_s29 }
  0x55   : > { %p781_p7 = scmp.ne.s32.totalorder %s1058_s5, %s780_s12  ;;  %s785_s8 = scalar_lea.hbm %s1200_s1, 256 }
  0x56   : > { %p786_p8 = scmp.lt.u32.totalorder %s1058_s5, %s1200_s1  ;;  %p787_p11 = scmp.lt.u32.totalorder %s785_s8, %s780_s12 }
  0x57   : > { %p783_p4 = pnand %p781_p7, %p752_p3  ;;  %p789_p0 = scmp.lt.u32.totalorder %s780_s12, %s1058_s5 }
  0x58   : > { %p788_p12 = por %p787_p11, %p786_p8 }
  0x59   : > { %p784_p6 = pneg %p783_p4 }
  0x5a   : > { %p790_p5 = por %p789_p0, %p788_p12 }
  0x5c   : > { %p791_p9 = pnand %p790_p5, %p784_p6 }
  0x5e   : > { %794 = shalt.err (!%p791_p9)
}
  0x5f   : > { %s795_s6 = scalar_lea.vmem %s224_s29, 128  ;;  %s906_s11 = smov [#allocation6]  }
  0x60   : > { %p796_p1 = scmp.ne.s32.totalorder %s224_s29, %s795_s6  ;;  %s800_s13 = sshll.u32 %s906_s11, 4  ;;  %s801_s13 = int_to_ptr.vmem [resolvable:$false] %s800_s13 }
  0x61   : > { %s802_s9 = scalar_lea.vmem %s801_s13, 256  ;;  %p803_p4 = scmp.lt.s32.totalorder %s224_s29, %s801_s13 }
  0x62   : > { %p798_p2 = pnand %p796_p1, %p752_p3  ;;  %p804_p10 = scmp.lt.s32.totalorder %s802_s9, %s795_s6 }
  0x64   : > { %p799_p7 = pneg %p798_p2  ;;  %p805_p8 = por %p804_p10, %p803_p4 }
  0x66   : > { %p806_p11 = pnand %p805_p8, %p799_p7 }
  0x68   : > { %809 = shalt.err (!%p806_p11)
}
  0x69   : > { %656 = dma.hbm_to_vmem [thread:$0]  (!%p1051_p13), %s1058_s5, 128, %s224_s29, %s212_s30  }
  0x6a   : > { %p1222_p6 = scmp.ne.s32.totalorder %s1214_s25, 0 }
  0x6b   : > { %s1111_s10 = sand.u32 (!%p1222_p6), 1, %s884_s16   ;;  %p1223_p10 = scmp.ne.s32.totalorder (!%p1222_p6), %s1212_s23, 0 }
  0x6c   : > { %232 = sbr.rel (%p1222_p6) target bundleno = 735 (0x2df), region = 36  ;;  %s1114_s2 = sshll.u32 (!%p1222_p6), %s1111_s10, 3 }
  0x6d   : > { %s235_s12 = scalar_lea.sflag (!%p1222_p6), [#allocation4], %s1111_s10  ;;  %s238_s22 = scalar_lea.vmem (!%p1222_p6), [#allocation3], %s1114_s2 }
  0x73   : > { %863 = dma.done.wait (%p1223_p10), %s235_s12, 128  }
  0x74   : > { %865 = vsyncadd (%p1223_p10), %s235_s12, 4294967168  ;;  %s243_s25 = sand.u32 1, %s966_s21   ;;  %s247_s5 = scalar_lea.vmem [#allocation6], %s1114_s2 }
  0x75   : > { %s244_s14 = scalar_lea.sflag [#allocation7], %s243_s25 }
  0x76   : > { %867 = dma.done.wait (%p1223_p10), %s244_s14, 128  }
  0x77   : > { %869 = vsyncadd (%p1223_p10), %s244_s14, 4294967168  ;;  %p1224_p13 = scmp.eq.s32.totalorder %s966_s21, 0 }
  0x79   : > { %871 = dma.done.wait (%p1224_p13), [#allocation7], 512   ;;  %p1225_p3 = pmov %p1224_p13 }
  0x7a   : > { %v907_v0 = vmov 0.0   ;;  %vm908_vm0 = vmmov 0   ;;  %v282_v1 = vld [vmem:[%s238_s22] sm:$0xff]  ;;  %vm294_vm1 = vcmask 261120   ;;  %v290_v5 = vld [vmem:[#allocation8 + $0x10] sm:$0xff]  ;;  %v291_v6 = vld [vmem:[#allocation8 + $0x18] sm:$0xff] }
  0x7b   : > { %873 = vsyncadd (%p1225_p3), [#allocation7], 4294966784  ;;  %624 = vmatprep.subr.bf16.mxu1 %v907_v0  ;;  %626 = vmatprep.mubr.msk.bf16.mxu1 %vm908_vm0, %v907_v0  ;;  %v288_v2 = vld [vmem:[#allocation8] sm:$0xff]  ;;  %v283_v3 = vpack.c.bf16 %v282_v1, %v282_v1  ;;  %v289_v4 = vld [vmem:[#allocation8 + $0x8] sm:$0xff]  ;;  %v293_v10 = vpack.c.bf16 %v291_v6, %v290_v5  ;;  %vm390_vm2 = vcmask 64512   ;;  %vm339_vm3 = vcmask 257024  }
  0x7c   : > { %616 = vmatprep.subr.bf16.mxu0 %v907_v0  ;;  %620 = vmatprep.mubr.msk.bf16.mxu0 %vm908_vm0, %v907_v0  ;;  %v292_v7 = vpack.c.bf16 %v289_v4, %v288_v2  ;;  %v341_v9 = vld [vmem:[%s247_s5] sm:$0xff]  ;;  %vm405_vm4 = vcmask 1043456   ;;  %s606_s29 = sshll.u32 %s892_s18, 7  ;;  %s280_s30 = scalar_lea.vmem [#allocation9], %s1114_s2 }
  0x7d   : > { %v348_v8 = vsel %vm294_vm1, %v283_v3, 0  ;;  %v342_v11 = vpack.c.bf16 %v341_v9, %v341_v9  ;;  %v604_v33 = vld [vmem:[%s1202_s3] ss:$0 sm:$0xff]  ;;  %s475_s27 = sshll.u32 %s280_s30, 4  ;;  %s1149_s19 = scalar_lea.hbm %s1203_s4, %s606_s29  ;;  %s1151_s27 = int_to_ptr.vmem [resolvable:$true] %s475_s27 }
  0x7e   : > { %625 = vmatpush3.bf16.xpose.msra.mxu1 %v348_v8  ;;  %617 = vmatpush3.bf16.msra.mxu0 %v292_v7  ;;  %s461_s18 = scalar_lea.sflag [#allocation5], %s1111_s10  ;;  %s810_s6 = scalar_lea.vmem %s1151_s27, 128 }
  0x7f   : > { %618 = vmatprep.subr.bf16.mxu0 %v907_v0  ;;  %p811_p12 = scmp.ne.s32.totalorder %s1151_s27, %s810_s6  ;;  %p1226_p0 = scmp.ne.s32.totalorder %s1220_s28, 0 }
  0x80   : > { %s909_s11 = smov [#allocation9]  }
  0x81   : > { %p812_p5 = pnand %p811_p12, %p1226_p0  ;;  %s814_s13 = sshll.u32 %s909_s11, 4  ;;  %s815_s13 = int_to_ptr.vmem [resolvable:$false] %s814_s13 }
  0x82   : > { %619 = vmatpush3.bf16.msra.mxu0 %v293_v10  ;;  %s816_s9 = scalar_lea.vmem %s815_s13, 256  ;;  %p817_p1 = scmp.lt.s32.totalorder %s1151_s27, %s815_s13 }
  0x83   : > { %630 = vmatprep.subr.bf16.mxu0 %v907_v0  ;;  %p813_p9 = pneg %p812_p5  ;;  %p818_p2 = scmp.lt.s32.totalorder %s816_s9, %s810_s6 }
  0x85   : > { %627 = vmatmul.mubr.msk.bf16.vlgmr.msra.gmra.mrb[0].mxu1 %vm294_vm1, %v342_v11  ;;  %621 = vmatmul.mubr.msk.bf16.vlgmr.msra.gmra.mrb[0].mxu0 %vm294_vm1, %v283_v3  ;;  %p819_p7 = por %p818_p2, %p817_p1 }
  0x86   : > { %632 = vmatprep.mubr.msk.bf16.mxu0 %vm908_vm0, %v907_v0 }
  0x87   : > { %p820_p4 = pnand %p819_p7, %p813_p9 }
 0x158   : > { %v384_v12 = vpop.f32.mrb[0].mxu1  ;;  %v332_v13 = vpop.f32.mrb[0].mxu0 }
 0x159   : > { %v628_v14 = vpop.f32.mrb[1].mxu1  ;;  %v391_v15 = vsel %vm390_vm2, %v384_v12, -inf  ;;  %v338_v16 = vpack.c.bf16 %v332_v13, %v332_v13  ;;  %v622_v17 = vpop.f32.mrb[1].mxu0 }
 0x15a   : > { %392 = vmax.xlane.f32.xlu0 %v391_v15  ;;  %v387_v18 = vpop.f32.mrb[2].mxu1  ;;  %v335_v19 = vpop.f32.mrb[2].mxu0 }
 0x15b   : > { %v629_v20 = vpop.f32.mrb[3].mxu1  ;;  %340 = vst.msk [vmem:[#allocation2] sm:$0xf] %vm339_vm3, %v338_v16  ;;  %v623_v21 = vpop.f32.mrb[3].mxu0 }
 0x162   : > { %v401_v22 = vld [vmem:[#allocation2] sm:$0xf] }
 0x163   : > { %v407_v23 = vsel %vm405_vm4, %v401_v22, 0 }
 0x164   : > { %631 = vmatpush3.bf16.msra.mxu0 %v407_v23 }
 0x1e7   : > { %v393_v24 = vpop.xlane.xlu0 %392 }
 0x1e8   : > { %v394_v25 = vsub.f32 %v384_v12, %v393_v24 }
 0x1ea   : > { %v395_v26 = vmul.f32 1.442695, %v394_v25 }
 0x1ec   : > { %718 = vpow2.f32 %v395_v26 }
 0x1f6   : > { %v719_v27 = vpop.eup %718 }
 0x1f7   : > { %v397_v28 = vsel %vm390_vm2, %v719_v27, 0.0  ;;  %v400_v29 = vpack.c.bf16 %v719_v27, %v719_v27 }
 0x1f8   : > { %398 = vadd.xlane.f32.xlu0 %v397_v28 }
 0x1f9   : > { %633 = vmatmul.mubr.msk.bf16.vlgmr.msra.gmra.mrb[4].mxu0 %vm390_vm2, %v400_v29 }
 0x285   : > { %v399_v30 = vpop.xlane.xlu0 %398 }
 0x286   : > { %720 = vrcp.f32 %v399_v30 }
 0x290   : > { %v721_v31 = vpop.eup %720 }
 0x2cc   : > { %v443_v32 = vpop.f32.mrb[4].mxu0 }
 0x2cd   : > { %v450_v34 = vmul.f32 %v721_v31, %v443_v32  ;;  %v634_v35 = vpop.f32.mrb[5].mxu0 }
 0x2ce   : > { %v446_v36 = vpop.f32.mrb[6].mxu0 }
 0x2cf   : > { %v458_v37 = vadd.f32 %v604_v33, %v450_v34  ;;  %v635_v38 = vpop.f32.mrb[7].mxu0 }
 0x2d1   : > { %459 = vst.msk [vmem:[%s280_s30] sm:$0xff] %vm294_vm1, %v458_v37 }
 0x2d2   : > { %823 = shalt.err (!%p820_p4)
}
 0x2d3   : > { %s824_s10 = scalar_lea.hbm %s1149_s19, 128  ;;  %s828_s22 = scalar_lea.hbm %s1203_s4, 256 }
 0x2d4   : > { %p825_p8 = scmp.ne.s32.totalorder %s1149_s19, %s824_s10  ;;  %p829_p10 = scmp.lt.u32.totalorder %s1149_s19, %s1203_s4 }
 0x2d5   : > { %p830_p13 = scmp.lt.u32.totalorder %s828_s22, %s824_s10  ;;  %p832_p12 = scmp.lt.u32.totalorder %s824_s10, %s1149_s19 }
 0x2d6   : > { %p826_p11 = pnand %p825_p8, %p1226_p0 }
 0x2d7   : > { %p831_p3 = por %p830_p13, %p829_p10 }
 0x2d8   : > { %p827_p6 = pneg %p826_p11 }
 0x2d9   : > { %p833_p5 = por %p832_p12, %p831_p3 }
 0x2db   : > { %p834_p9 = pnand %p833_p5, %p827_p6 }
 0x2dd   : > { %837 = shalt.err (!%p834_p9)
}
 0x2de   : > { %644 = dma.vmem_to_hbm [thread:$0]  (%p1226_p0), %s1151_s27, 128, %s1149_s19, %s461_s18  }
 0x2df PF: > { %s487_s5 = sand.u32 1, %s880_s15   ;;  %p1227_p1 = scmp.ne.s32.totalorder %s1213_s24, 0 }
 0x2e0   : > { %p1228_p2 = scmp.ge.s32.totalorder %s900_s20, 2  ;;  %s488_s21 = scalar_lea.sflag [#allocation5], %s487_s5 }
 0x2e2   : > { %p658_p7 = pnand %p1228_p2, %p1227_p1 }
 0x2e4   : > { %875 = dma.done.wait (!%p658_p7), %s488_s21, 128  }
 0x2e5   : > { %877 = vsyncadd (!%p658_p7), %s488_s21, 4294967168  ;;  %s23_s20 = sadd.s32 1, %s900_s20   ;;  %s1229_s18 = sld [smem:[#allocation14_spill]] }
 0x2e6   : > { %p20_p4 = scmp.ge.s32.totalorder %s23_s20, 4   ;;  %s1230_s19 = sld [smem:[#allocation15_spill]] }
 0x2e7   : > { %s1231_s15 = smov %s884_s16  ;;  %s1232_s16 = smov %s888_s17 }
 0x2e8   : > { %s1233_s17 = smov %s1038_s7  ;;  %22 = sbr.rel (!%p20_p4) target bundleno = 10 (0xa), region = 102 }
 0x2ef   :  { %493 = vsyncpa [#allocation4], 1 }
 0x2f0   :  { %495 = vsyncpa [#allocation4 + $0x1], 1 }
 0x2f1   :  { %496 = vsyncpa [#allocation7], 1 }
 0x2f2   :  { %498 = vsyncpa [#allocation7 + $0x1], 1 }
 0x2f3   :  { %499 = vsyncpa [#allocation5], 1 }
 0x2f4   :  { %501 = vsyncpa [#allocation5 + $0x1], 1 }

</bundles_post_ra>
